<compile_context>
chip_gen: v6e
topology: v6e:2x2x1
jax: 0.10.0
libtpu: 0.0.40
codegen_flags: <defaults>
</compile_context>

<pallas_src>
import functools

import jax
import jax.numpy as jnp
from jax.experimental import pallas as pl
from jax.experimental.pallas import tpu as pltpu


def _round_up(x, m):
    return ((x + m - 1) // m) * m


def _largest_tile(dim_padded, cap):
    """Largest multiple of 128 that is <= cap and divides dim_padded
    (dim_padded is already a multiple of 128)."""
    best = 128
    t = 128
    while t <= min(cap, dim_padded):
        if dim_padded % t == 0:
            best = t
        t += 128
    return best


# ---------------------------------------------------------------------------
# Kernels
# ---------------------------------------------------------------------------

def _fused_mlp_kernel(*refs, num_layers, compute_dtype):
    """Whole MLP in one kernel: everything resident in VMEM.
    refs = (x, w0, b0, w1, b1, ..., o)."""
    x_ref = refs[0]
    o_ref = refs[-1]
    h = x_ref[...]
    for i in range(num_layers):
        w_ref = refs[1 + 2 * i]
        b_ref = refs[2 + 2 * i]
        y = jnp.dot(h, w_ref[...], preferred_element_type=jnp.float32)
        y = y + b_ref[...]                       # (1, Np) f32 broadcast
        if i < num_layers - 1:
            h = jnp.maximum(y, 0.0).astype(compute_dtype)
        else:
            o_ref[...] = y.astype(o_ref.dtype)


def _linear_single_k_kernel(x_ref, w_ref, b_ref, o_ref, *, apply_relu):
    """K fits one tile: no scratch, single write of dot + bias (+ReLU)."""
    y = jnp.dot(x_ref[...], w_ref[...], preferred_element_type=jnp.float32)
    y = y + b_ref[...]
    if apply_relu:
        y = jnp.maximum(y, 0.0)
    o_ref[...] = y.astype(o_ref.dtype)


def _linear_acc_kernel(x_ref, w_ref, b_ref, o_ref, acc_ref, *, apply_relu):
    """K split across the grid: f32 accumulator initialised with the bias."""
    k = pl.program_id(2)

    @pl.when(k == 0)
    def _():
        acc_ref[...] = jnp.broadcast_to(b_ref[...], acc_ref.shape)

    acc_ref[...] += jnp.dot(
        x_ref[...], w_ref[...], preferred_element_type=jnp.float32
    )

    @pl.when(k == pl.num_programs(2) - 1)
    def _():
        y = acc_ref[...]
        if apply_relu:
            y = jnp.maximum(y, 0.0)
        o_ref[...] = y.astype(o_ref.dtype)


# ---------------------------------------------------------------------------
# Wrappers
# ---------------------------------------------------------------------------

def _linear_pallas(h, wt, bp, *, tm, apply_relu, out_dtype,
                   n_tile_cap=1024, k_tile_cap=1024):
    """h: (Mp, Kp) compute dtype; wt: (Kp, Np) compute dtype; bp: (1, Np) f32."""
    mp, kp = h.shape
    kp_w, np_ = wt.shape
    assert kp == kp_w, (kp, kp_w)

    tn = _largest_tile(np_, n_tile_cap)
    tk = _largest_tile(kp, k_tile_cap)

    # v7x megacore: if M fits one tile, make sure the N axis has >=2 blocks so
    # the second TensorCore isn't idle.
    if mp // tm == 1 and tn == np_ and np_ % 256 == 0:
        tn = np_ // 2

    gm, gn, gk = mp // tm, np_ // tn, kp // tk

    if gk == 1:
        return pl.pallas_call(
            functools.partial(_linear_single_k_kernel, apply_relu=apply_relu),
            out_shape=jax.ShapeDtypeStruct((mp, np_), out_dtype),
            grid_spec=pltpu.PrefetchScalarGridSpec(
                num_scalar_prefetch=0,
                grid=(gm, gn),
                in_specs=[
                    pl.BlockSpec((tm, kp), lambda i, j: (i, 0)),   # activations
                    pl.BlockSpec((kp, tn), lambda i, j: (0, j)),   # W^T tile
                    pl.BlockSpec((1, tn), lambda i, j: (0, j)),    # bias row
                ],
                out_specs=pl.BlockSpec((tm, tn), lambda i, j: (i, j)),
            ),
            compiler_params=pltpu.CompilerParams(
                dimension_semantics=("parallel", "parallel")),
        )(h, wt, bp)

    return pl.pallas_call(
        functools.partial(_linear_acc_kernel, apply_relu=apply_relu),
        out_shape=jax.ShapeDtypeStruct((mp, np_), out_dtype),
        grid_spec=pltpu.PrefetchScalarGridSpec(
            num_scalar_prefetch=0,
            grid=(gm, gn, gk),
            in_specs=[
                pl.BlockSpec((tm, tk), lambda i, j, k: (i, k)),
                pl.BlockSpec((tk, tn), lambda i, j, k: (k, j)),
                pl.BlockSpec((1, tn), lambda i, j, k: (0, j)),
            ],
            out_specs=pl.BlockSpec((tm, tn), lambda i, j, k: (i, j)),
            scratch_shapes=[pltpu.VMEM((tm, tn), jnp.float32)],
        ),
        compiler_params=pltpu.CompilerParams(
            dimension_semantics=("parallel", "parallel", "arbitrary")),
    )(h, wt, bp)


def make_mlp(params, compute_dtype=jnp.bfloat16,
             fused_vmem_budget=8 * 1024 * 1024):
    """params: list of (weight (out,in), bias (out,)) per layer (PyTorch layout).

    Returns a jitted forward(x) with the same semantics as the PyTorch MLP
    (ReLU between layers, no activation on the last layer), with matmuls run
    in `compute_dtype` on the MXU and f32 accumulation."""
    num_layers = len(params)
    n_last = int(params[-1][0].shape[0])

    # --- one-time parameter prep (transpose, pad to 128 multiples, cast) ---
    prepared = []
    for w, b in params:
        n, k = w.shape
        kp, np_ = _round_up(k, 128), _round_up(n, 128)
        wt = jnp.pad(w.T.astype(compute_dtype), ((0, kp - k), (0, np_ - n)))
        bp = jnp.pad(b.astype(jnp.float32), (0, np_ - n)).reshape(1, np_)
        prepared.append((wt, bp))

    itemsize = jnp.dtype(compute_dtype).itemsize
    weight_bytes = sum(wt.size * itemsize + bp.size * 4 for wt, bp in prepared)
    max_np = max(wt.shape[1] for wt, _ in prepared)
    kp0 = prepared[0][0].shape[0]
    m_align = 16 if itemsize == 2 else 8          # bf16 sublane packing

    def forward(x):
        orig_dtype = x.dtype
        lead = x.shape[:-1]
        x2 = x.reshape(-1, x.shape[-1])
        m, k0 = x2.shape

        tm = min(256, _round_up(m, m_align))
        mp = _round_up(m, tm)

        # Pad rows + features once; activations stay padded across all layers.
        xp = jnp.pad(x2, ((0, mp - m), (0, kp0 - k0))).astype(compute_dtype)

        act_bytes = 2 * mp * max(max_np, kp0) * 4
        use_fused = (mp <= 512 and
                     weight_bytes + mp * kp0 * itemsize + act_bytes
                     <= fused_vmem_budget)

        if use_fused:
            np_last = prepared[-1][0].shape[1]
            inputs = [xp]
            for wt, bp in prepared:
                inputs.extend([wt, bp])
            out = pl.pallas_call(
                functools.partial(_fused_mlp_kernel,
                                  num_layers=num_layers,
                                  compute_dtype=compute_dtype),
                out_shape=jax.ShapeDtypeStruct((mp, np_last), orig_dtype),
                grid_spec=pltpu.PrefetchScalarGridSpec(
                    num_scalar_prefetch=0,
                    grid=(1,),
                    in_specs=[pl.BlockSpec(a.shape, lambda i: (0, 0))
                              for a in inputs],
                    out_specs=pl.BlockSpec((mp, np_last), lambda i: (0, 0)),
                ),
                compiler_params=pltpu.CompilerParams(
                    dimension_semantics=("arbitrary",)),
            )(*inputs)
        else:
            h = xp
            for i, (wt, bp) in enumerate(prepared):
                last = i == num_layers - 1
                h = _linear_pallas(
                    h, wt, bp, tm=tm, apply_relu=not last,
                    out_dtype=orig_dtype if last else compute_dtype)
            out = h

        y = out[:m, :n_last].astype(orig_dtype)
        return y.reshape(*lead, n_last)

    return jax.jit(forward)


# ---------------------------------------------------------------------------
# Demo / correctness check
# ---------------------------------------------------------------------------

if __name__ == "__main__":
    key = jax.random.PRNGKey(0)
    compute_dtype = jnp.bfloat16

    def make_params(k, input_dim, hidden_dim, output_dim, num_layers):
        dims_in = [input_dim] + [hidden_dim] * (num_layers - 1)
        dims_out = [hidden_dim] * (num_layers - 1) + [output_dim]
        keys = jax.random.split(k, 2 * num_layers)
        params = []
        for li, (din, dout) in enumerate(zip(dims_in, dims_out)):
            bound = 1.0 / (din ** 0.5)            # nn.Linear default init scale
            w = jax.random.uniform(keys[2 * li], (dout, din), jnp.float32,
                                   -bound, bound)
            b = jax.random.uniform(keys[2 * li + 1], (dout,), jnp.float32,
                                   -bound, bound)
            params.append((w, b))
        return params

    def ref_forward(x, params, cdt):
        # Pure-JAX reference matching the kernel's precision choices
        # (bf16 operands, f32 accumulation, f32 bias/ReLU).
        lead = x.shape[:-1]
        h = x.reshape(-1, x.shape[-1])
        L = len(params)
        for i, (w, b) in enumerate(params):
            y = jnp.dot(h.astype(cdt), w.T.astype(cdt),
                        preferred_element_type=jnp.float32) + b.astype(jnp.float32)
            if i < L - 1:
                h = jnp.maximum(y, 0.0).astype(cdt)
            else:
                h = y.astype(x.dtype)
        return h.reshape(*lead, params[-1][0].shape[0])

    k1, k2, k3, k4 = jax.random.split(key, 4)

    # --- Test 1: module demo shapes (exercises the fused single-kernel path) ---
    B, S = 2, 8
    input_dim, hidden_dim, output_dim, num_layers = 32, 32, 4, 3
    params1 = make_params(k1, input_dim, hidden_dim, output_dim, num_layers)
    x1 = jax.random.normal(k2, (B, S, input_dim), dtype=jnp.float32)
    mlp1 = make_mlp(params1, compute_dtype=compute_dtype)
    y1 = jax.block_until_ready(mlp1(x1))
    y1_ref = ref_forward(x1, params1, compute_dtype)
    assert y1.shape == (B, S, output_dim)
    assert jnp.allclose(y1, y1_ref, atol=1e-2, rtol=1e-2)

    # --- Test 2: larger shapes (exercises the tiled path, incl. the K-split
    #     accumulator kernel on layer 0 where K=1536 > 1024) ---
    B2, S2 = 8, 128
    in2, hid2, out2, L2 = 1536, 512, 96, 3
    params2 = make_params(k3, in2, hid2, out2, L2)
    x2 = jax.random.normal(k4, (B2, S2, in2), dtype=jnp.float32)
    mlp2 = make_mlp(params2, compute_dtype=compute_dtype)
    y2 = jax.block_until_ready(mlp2(x2))
    y2_ref = ref_forward(x2, params2, compute_dtype)
    assert y2.shape == (B2, S2, out2)
    assert jnp.allclose(y2, y2_ref, atol=2e-2, rtol=2e-2)

    print("KERNEL_OK")
</pallas_src>

<mosaic_0001>
module attributes {stable_mosaic.version = 11 : i64} {
  func.func @_fused_mlp_kernel(%arg0: i32, %arg1: memref<16x128xbf16, #tpu.memory_space<vmem>>, %arg2: memref<128x128xbf16, #tpu.memory_space<vmem>>, %arg3: memref<1x128xf32, #tpu.memory_space<vmem>>, %arg4: memref<128x128xbf16, #tpu.memory_space<vmem>>, %arg5: memref<1x128xf32, #tpu.memory_space<vmem>>, %arg6: memref<128x128xbf16, #tpu.memory_space<vmem>>, %arg7: memref<1x128xf32, #tpu.memory_space<vmem>>, %arg8: memref<16x128xf32, #tpu.memory_space<vmem>>) attributes {dimension_semantics = [#tpu.dimension_semantics<arbitrary>], iteration_bounds = array<i64: 1>, scalar_prefetch = 0 : i64, scratch_operands = 0 : i64, tpu.core_type = #tpu.core_type<tc>, window_params = [{pipeline_mode = #tpu.pipeline_mode<synchronous>, transform_indices = @transform_0, window_bounds = array<i64: 16, 128>}, {pipeline_mode = #tpu.pipeline_mode<synchronous>, transform_indices = @transform_1, window_bounds = array<i64: 128, 128>}, {pipeline_mode = #tpu.pipeline_mode<synchronous>, transform_indices = @transform_2, window_bounds = array<i64: 1, 128>}, {pipeline_mode = #tpu.pipeline_mode<synchronous>, transform_indices = @transform_3, window_bounds = array<i64: 128, 128>}, {pipeline_mode = #tpu.pipeline_mode<synchronous>, transform_indices = @transform_4, window_bounds = array<i64: 1, 128>}, {pipeline_mode = #tpu.pipeline_mode<synchronous>, transform_indices = @transform_5, window_bounds = array<i64: 128, 128>}, {pipeline_mode = #tpu.pipeline_mode<synchronous>, transform_indices = @transform_6, window_bounds = array<i64: 1, 128>}, {pipeline_mode = #tpu.pipeline_mode<synchronous>, transform_indices = @transform_7, window_bounds = array<i64: 16, 128>}]} {
    %c0 = arith.constant 0 : index
    %c0_0 = arith.constant 0 : index
    %0 = vector.load %arg1[%c0, %c0_0] : memref<16x128xbf16, #tpu.memory_space<vmem>>, vector<16x128xbf16>
    %c0_1 = arith.constant 0 : index
    %c0_2 = arith.constant 0 : index
    %1 = vector.load %arg2[%c0_1, %c0_2] : memref<128x128xbf16, #tpu.memory_space<vmem>>, vector<128x128xbf16>
    %cst = arith.constant dense<0.000000e+00> : vector<16x128xf32>
    %2 = tpu.matmul %0, %1, %cst {dimension_numbers = #tpu.dot_dimension_numbers<[1], [0], [0], [1], [0, 0, 1, 1], [], []>} : vector<16x128xbf16>, vector<128x128xbf16>, vector<16x128xf32> -> vector<16x128xf32>
    %c0_3 = arith.constant 0 : index
    %c0_4 = arith.constant 0 : index
    %3 = vector.load %arg3[%c0_3, %c0_4] : memref<1x128xf32, #tpu.memory_space<vmem>>, vector<1x128xf32>
    %4 = vector.broadcast %3 : vector<1x128xf32> to vector<16x128xf32>
    %5 = arith.addf %2, %4 : vector<16x128xf32>
    %cst_5 = arith.constant 0.000000e+00 : f32
    %6 = vector.broadcast %cst_5 : f32 to vector<16x128xf32>
    %7 = arith.maximumf %5, %6 : vector<16x128xf32>
    %8 = arith.truncf %7 : vector<16x128xf32> to vector<16x128xbf16>
    %c0_6 = arith.constant 0 : index
    %c0_7 = arith.constant 0 : index
    %9 = vector.load %arg4[%c0_6, %c0_7] : memref<128x128xbf16, #tpu.memory_space<vmem>>, vector<128x128xbf16>
    %cst_8 = arith.constant dense<0.000000e+00> : vector<16x128xf32>
    %10 = tpu.matmul %8, %9, %cst_8 {dimension_numbers = #tpu.dot_dimension_numbers<[1], [0], [0], [1], [0, 0, 1, 1], [], []>} : vector<16x128xbf16>, vector<128x128xbf16>, vector<16x128xf32> -> vector<16x128xf32>
    %c0_9 = arith.constant 0 : index
    %c0_10 = arith.constant 0 : index
    %11 = vector.load %arg5[%c0_9, %c0_10] : memref<1x128xf32, #tpu.memory_space<vmem>>, vector<1x128xf32>
    %12 = vector.broadcast %11 : vector<1x128xf32> to vector<16x128xf32>
    %13 = arith.addf %10, %12 : vector<16x128xf32>
    %cst_11 = arith.constant 0.000000e+00 : f32
    %14 = vector.broadcast %cst_11 : f32 to vector<16x128xf32>
    %15 = arith.maximumf %13, %14 : vector<16x128xf32>
    %16 = arith.truncf %15 : vector<16x128xf32> to vector<16x128xbf16>
    %c0_12 = arith.constant 0 : index
    %c0_13 = arith.constant 0 : index
    %17 = vector.load %arg6[%c0_12, %c0_13] : memref<128x128xbf16, #tpu.memory_space<vmem>>, vector<128x128xbf16>
    %cst_14 = arith.constant dense<0.000000e+00> : vector<16x128xf32>
    %18 = tpu.matmul %16, %17, %cst_14 {dimension_numbers = #tpu.dot_dimension_numbers<[1], [0], [0], [1], [0, 0, 1, 1], [], []>} : vector<16x128xbf16>, vector<128x128xbf16>, vector<16x128xf32> -> vector<16x128xf32>
    %c0_15 = arith.constant 0 : index
    %c0_16 = arith.constant 0 : index
    %19 = vector.load %arg7[%c0_15, %c0_16] : memref<1x128xf32, #tpu.memory_space<vmem>>, vector<1x128xf32>
    %20 = vector.broadcast %19 : vector<1x128xf32> to vector<16x128xf32>
    %21 = arith.addf %18, %20 : vector<16x128xf32>
    %c0_17 = arith.constant 0 : index
    %c0_18 = arith.constant 0 : index
    %22 = vector.load %arg8[%c0_17, %c0_18] : memref<16x128xf32, #tpu.memory_space<vmem>>, vector<16x128xf32>
    tpu.vector_store %arg8[%c0_17, %c0_18], %21 {strides = array<i32>} : memref<16x128xf32, #tpu.memory_space<vmem>>, vector<16x128xf32>,
    return
  }
  func.func @transform_0(%arg0: i32) -> (i32, i32) {
    %c0_i32 = arith.constant 0 : i32
    %c0_i32_0 = arith.constant 0 : i32
    %c0_i32_1 = arith.constant 0 : i32
    return %c0_i32, %c0_i32_0 : i32, i32
  }
  func.func @transform_1(%arg0: i32) -> (i32, i32) {
    %c0_i32 = arith.constant 0 : i32
    %c0_i32_0 = arith.constant 0 : i32
    %c0_i32_1 = arith.constant 0 : i32
    return %c0_i32, %c0_i32_0 : i32, i32
  }
  func.func @transform_2(%arg0: i32) -> (i32, i32) {
    %c0_i32 = arith.constant 0 : i32
    %c0_i32_0 = arith.constant 0 : i32
    %c0_i32_1 = arith.constant 0 : i32
    return %c0_i32, %c0_i32_0 : i32, i32
  }
  func.func @transform_3(%arg0: i32) -> (i32, i32) {
    %c0_i32 = arith.constant 0 : i32
    %c0_i32_0 = arith.constant 0 : i32
    %c0_i32_1 = arith.constant 0 : i32
    return %c0_i32, %c0_i32_0 : i32, i32
  }
  func.func @transform_4(%arg0: i32) -> (i32, i32) {
    %c0_i32 = arith.constant 0 : i32
    %c0_i32_0 = arith.constant 0 : i32
    %c0_i32_1 = arith.constant 0 : i32
    return %c0_i32, %c0_i32_0 : i32, i32
  }
  func.func @transform_5(%arg0: i32) -> (i32, i32) {
    %c0_i32 = arith.constant 0 : i32
    %c0_i32_0 = arith.constant 0 : i32
    %c0_i32_1 = arith.constant 0 : i32
    return %c0_i32, %c0_i32_0 : i32, i32
  }
  func.func @transform_6(%arg0: i32) -> (i32, i32) {
    %c0_i32 = arith.constant 0 : i32
    %c0_i32_0 = arith.constant 0 : i32
    %c0_i32_1 = arith.constant 0 : i32
    return %c0_i32, %c0_i32_0 : i32, i32
  }
  func.func @transform_7(%arg0: i32) -> (i32, i32) {
    %c0_i32 = arith.constant 0 : i32
    %c0_i32_0 = arith.constant 0 : i32
    %c0_i32_1 = arith.constant 0 : i32
    return %c0_i32, %c0_i32_0 : i32, i32
  }
}

</mosaic_0001>

<bundles_post_ra>
// kernel: forward.1
= control target key start
LH: loop header
LB: loop body
LE: loop exit
PB: predicated region body
PF: predicated region fallthrough
CT: control target
= control target key end

     0   :  { %12 = vsyncpa [#allocation3], 0  ;;  %s741_s0 = inlined_call_operand.vmem [shape: bf16[16,128], index: 0, kind: input, shape index: {}]   ;;  %s742_s1 = inlined_call_operand.hbm [shape: bf16[128,128], index: 1, kind: input, shape index: {}]   ;;  %s743_s2 = inlined_call_operand.vmem [shape: f32[1,128], index: 2, kind: input, shape index: {}]   ;;  %s744_s3 = inlined_call_operand.hbm [shape: bf16[128,128], index: 3, kind: input, shape index: {}]   ;;  %s745_s4 = inlined_call_operand.vmem [shape: f32[1,128], index: 4, kind: input, shape index: {}]   ;;  %s746_s5 = inlined_call_operand.hbm [shape: bf16[128,128], index: 5, kind: input, shape index: {}]   ;;  %s747_s6 = inlined_call_operand.vmem [shape: f32[1,128], index: 6, kind: input, shape index: {}]   ;;  %s748_s7 = inlined_call_operand.vmem [shape: f32[16,128], index: 7, kind: output, shape index: {}]  }
   0x1   :  { %13 = vsyncpa [#allocation5], 0  ;;  %s637_s24 = smov [#allocation4]   ;;  %s638_s26 = smov [#allocation2]  }
   0x2   :  { %s35_s25 = sshll.u32 %s637_s24, 4  ;;  %s21_s27 = sshll.u32 %s638_s26, 4  ;;  %s36_s25 = int_to_ptr.vmem [resolvable:$true] %s35_s25  ;;  %s22_s27 = int_to_ptr.vmem [resolvable:$true] %s21_s27 }
   0x3   :  { %s581_s28 = scalar_lea.vmem %s36_s25, 1024  ;;  %p586_p1 = scmp.lt.s32.totalorder %s36_s25, %s36_s25 }
   0x4   :  { %p582_p0 = scmp.ne.s32.totalorder %s36_s25, %s581_s28  ;;  %p587_p2 = scmp.lt.s32.totalorder %s581_s28, %s581_s28 }
   0x6   :  { %p588_p3 = por %p587_p2, %p586_p1 }
   0x8   :  { %p589_p4 = pnand %p588_p3, %p582_p0 }
   0xa   :  { %592 = shalt.err (!%p589_p4)
}
   0xb   :  { %s639_s29 = smov 64   ;;  %s640_s30 = smov 4  }
   0xc   :  { %41 = dma.hbm_to_vmem [thread:$0]  %s744_s3, 1024, %s36_s25, [#allocation5], %s639_s29, %s639_s29, %s640_s30  }
   0xd   :  { %s601_s10 = scalar_lea.vmem %s22_s27, 1024  ;;  %p606_p6 = scmp.lt.s32.totalorder %s22_s27, %s22_s27 }
   0xe   :  { %p602_p5 = scmp.ne.s32.totalorder %s22_s27, %s601_s10  ;;  %p607_p7 = scmp.lt.s32.totalorder %s601_s10, %s601_s10 }
  0x10   :  { %p608_p8 = por %p607_p7, %p606_p6 }
  0x12   :  { %p609_p9 = pnand %p608_p8, %p602_p5 }
  0x14   :  { %612 = shalt.err (!%p609_p9)
}
  0x15   :  { %27 = dma.hbm_to_vmem [thread:$0]  %s742_s1, 1024, %s22_s27, [#allocation3], %s639_s29, %s639_s29, %s640_s30  }
  0x16   :  { %s641_s13 = smov [#allocation6]  }
  0x17   :  { %s49_s14 = sshll.u32 %s641_s13, 4  ;;  %s50_s14 = int_to_ptr.vmem [resolvable:$true] %s49_s14 }
  0x18   :  { %s621_s15 = scalar_lea.vmem %s50_s14, 1024  ;;  %p626_p11 = scmp.lt.s32.totalorder %s50_s14, %s50_s14 }
  0x19   :  { %p622_p10 = scmp.ne.s32.totalorder %s50_s14, %s621_s15  ;;  %p627_p12 = scmp.lt.s32.totalorder %s621_s15, %s621_s15 }
  0x1b   :  { %p628_p13 = por %p627_p12, %p626_p11 }
  0x1d   :  { %p629_p0 = pnand %p628_p13, %p622_p10 }
  0x1f   :  { %632 = shalt.err (!%p629_p0)
}
  0x20   :  { %55 = dma.hbm_to_vmem [thread:$0]  %s746_s5, 1024, %s50_s14, [#allocation5], %s639_s29, %s639_s29, %s640_s30  }
  0x21   :  { %633 = dma.done.wait [#allocation3], 1024  }
  0x22   :  { %634 = vsyncadd [#allocation3], 4294966272 }
  0x23   :  { %635 = dma.done.wait [#allocation5], 2048  }
  0x24   :  { %636 = vsyncadd [#allocation5], 4294965248  ;;  %v642_v0 = vmov 0.0   ;;  %vm643_vm0 = vmmov 0   ;;  %v548_v1 = vld [vmem:[#allocation2 + $0x38] sm:$0xff]   ;;  %v549_v2 = vld [vmem:[#allocation2 + $0x30] sm:$0xff]  }
  0x25   :  { %481 = vmatprep.subr.bf16.mxu0 %v642_v0  ;;  %497 = vmatprep.mubr.msk.bf16.mxu0 %vm643_vm0, %v642_v0  ;;  %v550_v3 = vld [vmem:[#allocation2 + $0x28] sm:$0xff]   ;;  %v557_v4 = vld [vmem:[#allocation4 + $0x38] sm:$0xff]   ;;  %v551_v5 = vld [vmem:[#allocation2 + $0x20] sm:$0xff]  }
  0x26   :  { %501 = vmatprep.subr.bf16.mxu1 %v642_v0  ;;  %517 = vmatprep.mubr.msk.bf16.mxu1 %vm643_vm0, %v642_v0  ;;  %v558_v6 = vld [vmem:[#allocation4 + $0x30] sm:$0xff]   ;;  %v552_v7 = vld [vmem:[#allocation2 + $0x18] sm:$0xff]   ;;  %v559_v8 = vld [vmem:[#allocation4 + $0x28] sm:$0xff]  }
  0x27   :  { %482 = vmatpush3.bf16.msra.mxu0 %v548_v1  ;;  %502 = vmatpush3.bf16.msra.mxu1 %v557_v4  ;;  %v553_v9 = vld [vmem:[#allocation2 + $0x10] sm:$0xff]   ;;  %v560_v10 = vld [vmem:[#allocation4 + $0x20] sm:$0xff]   ;;  %v554_v11 = vld [vmem:[#allocation2 + $0x8] sm:$0xff]  }
  0x28   :  { %483 = vmatprep.subr.bf16.mxu0 %v642_v0  ;;  %503 = vmatprep.subr.bf16.mxu1 %v642_v0  ;;  %v561_v12 = vld [vmem:[#allocation4 + $0x18] sm:$0xff]   ;;  %v555_v13 = vld [vmem:[#allocation2] sm:$0xff]   ;;  %v562_v15 = vld [vmem:[#allocation4 + $0x10] sm:$0xff]  }
  0x29   :  { %v556_v14 = vld [vmem:[%s741_s0] sm:$0xff]   ;;  %v563_v16 = vld [vmem:[#allocation4 + $0x8] sm:$0xff]   ;;  %v565_v18 = vld [vmem:[#allocation6 + $0x38] sm:$0xff]  }
  0x2a   :  { %v564_v17 = vld [vmem:[#allocation4] sm:$0xff]   ;;  %v566_v19 = vld [vmem:[#allocation6 + $0x30] sm:$0xff]   ;;  %v567_v20 = vld [vmem:[#allocation6 + $0x28] sm:$0xff]  }
  0x2b   :  { %484 = vmatpush3.bf16.msra.mxu0 %v549_v2  ;;  %504 = vmatpush3.bf16.msra.mxu1 %v558_v6  ;;  %v568_v21 = vld [vmem:[#allocation6 + $0x20] sm:$0xff]   ;;  %v569_v22 = vld [vmem:[#allocation6 + $0x18] sm:$0xff]   ;;  %v570_v33 = vld [vmem:[#allocation6 + $0x10] sm:$0xff]  }
  0x2c   :  { %485 = vmatprep.subr.bf16.mxu0 %v642_v0  ;;  %505 = vmatprep.subr.bf16.mxu1 %v642_v0  ;;  %v426_v23 = vld [vmem:[%s743_s2] ss:$0 sm:$0xff]  ;;  %v571_v34 = vld [vmem:[#allocation6 + $0x8] sm:$0xff]  }
  0x2d   :  { %v572_v35 = vld [vmem:[#allocation6] sm:$0xff]  }
  0x2e   :  { %v436_v36 = vld [vmem:[%s745_s4] ss:$0 sm:$0xff] }
  0x2f   :  { %486 = vmatpush3.bf16.msra.mxu0 %v550_v3  ;;  %506 = vmatpush3.bf16.msra.mxu1 %v559_v8  ;;  %v445_v46 = vld [vmem:[%s747_s6] ss:$0 sm:$0xff] }
  0x30   :  { %487 = vmatprep.subr.bf16.mxu0 %v642_v0  ;;  %507 = vmatprep.subr.bf16.mxu1 %v642_v0 }
  0x33   :  { %488 = vmatpush3.bf16.msra.mxu0 %v551_v5  ;;  %508 = vmatpush3.bf16.msra.mxu1 %v560_v10 }
  0x34   :  { %489 = vmatprep.subr.bf16.mxu0 %v642_v0  ;;  %509 = vmatprep.subr.bf16.mxu1 %v642_v0 }
  0x37   :  { %490 = vmatpush3.bf16.msra.mxu0 %v552_v7  ;;  %510 = vmatpush3.bf16.msra.mxu1 %v561_v12 }
  0x38   :  { %491 = vmatprep.subr.bf16.mxu0 %v642_v0  ;;  %511 = vmatprep.subr.bf16.mxu1 %v642_v0 }
  0x3b   :  { %492 = vmatpush3.bf16.msra.mxu0 %v553_v9  ;;  %512 = vmatpush3.bf16.msra.mxu1 %v562_v15 }
  0x3c   :  { %493 = vmatprep.subr.bf16.mxu0 %v642_v0  ;;  %513 = vmatprep.subr.bf16.mxu1 %v642_v0 }
  0x3f   :  { %494 = vmatpush3.bf16.msra.mxu0 %v554_v11  ;;  %514 = vmatpush3.bf16.msra.mxu1 %v563_v16 }
  0x40   :  { %495 = vmatprep.subr.bf16.mxu0 %v642_v0  ;;  %515 = vmatprep.subr.bf16.mxu1 %v642_v0 }
  0x43   :  { %496 = vmatpush3.bf16.msra.mxu0 %v555_v13  ;;  %516 = vmatpush3.bf16.msra.mxu1 %v564_v17 }
  0x44   :  { %521 = vmatprep.subr.bf16.mxu0 %v642_v0 }
  0x46   :  { %498 = vmatmul.mubr.bf16.vlgmr.msra.gmra.mxu0 %v556_v14 }
  0x47   :  { %537 = vmatprep.mubr.msk.bf16.mxu0 %vm643_vm0, %v642_v0  ;;  %522 = vmatpush3.bf16.msra.mxu0 %v565_v18 }
  0x48   :  { %523 = vmatprep.subr.bf16.mxu0 %v642_v0 }
  0x4b   :  { %524 = vmatpush3.bf16.msra.mxu0 %v566_v19 }
  0x4c   :  { %525 = vmatprep.subr.bf16.mxu0 %v642_v0 }
  0x4f   :  { %526 = vmatpush3.bf16.msra.mxu0 %v567_v20 }
  0x50   :  { %527 = vmatprep.subr.bf16.mxu0 %v642_v0 }
  0x53   :  { %528 = vmatpush3.bf16.msra.mxu0 %v568_v21 }
  0x54   :  { %529 = vmatprep.subr.bf16.mxu0 %v642_v0 }
  0x57   :  { %530 = vmatpush3.bf16.msra.mxu0 %v569_v22 }
  0x58   :  { %531 = vmatprep.subr.bf16.mxu0 %v642_v0 }
  0x5b   :  { %532 = vmatpush3.bf16.msra.mxu0 %v570_v33 }
  0x5c   :  { %533 = vmatprep.subr.bf16.mxu0 %v642_v0 }
  0x5f   :  { %534 = vmatpush3.bf16.msra.mxu0 %v571_v34 }
  0x60   :  { %535 = vmatprep.subr.bf16.mxu0 %v642_v0 }
  0x63   :  { %536 = vmatpush3.bf16.msra.mxu0 %v572_v35 }
 0x106   :  { %v181_v24 = vpop.f32.mrf.mxu0 }
 0x107   :  { %v182_v26 = vadd.f32 %v426_v23, %v181_v24 }
 0x108   :  { %v499_v25 = vpop.f32.mrf.mxu0 }
 0x109   :  { %v188_v30 = vmax.f32 %v182_v26, 0.0 }
 0x10a   :  { %v184_v27 = vpop.f32.mrf.mxu0 }
 0x10b   :  { %v185_v28 = vadd.f32 %v426_v23, %v184_v27 }
 0x10c   :  { %v500_v29 = vpop.f32.mrf.mxu0 }
 0x10d   :  { %v189_v31 = vmax.f32 %v185_v28, 0.0 }
 0x10f   :  { %v190_v32 = vpack.c.bf16 %v189_v31, %v188_v30 }
 0x111   :  { %518 = vmatmul.mubr.bf16.vlgmr.msra.gmra.mxu1 %v190_v32 }
 0x1d1   :  { %v296_v37 = vpop.f32.mrf.mxu1 }
 0x1d2   :  { %v297_v39 = vadd.f32 %v436_v36, %v296_v37 }
 0x1d3   :  { %v519_v38 = vpop.f32.mrf.mxu1 }
 0x1d4   :  { %v303_v43 = vmax.f32 %v297_v39, 0.0 }
 0x1d5   :  { %v299_v40 = vpop.f32.mrf.mxu1 }
 0x1d6   :  { %v300_v41 = vadd.f32 %v436_v36, %v299_v40 }
 0x1d7   :  { %v520_v42 = vpop.f32.mrf.mxu1 }
 0x1d8   :  { %v304_v44 = vmax.f32 %v300_v41, 0.0 }
 0x1da   :  { %v305_v45 = vpack.c.bf16 %v304_v44, %v303_v43 }
 0x1dc   :  { %538 = vmatmul.mubr.bf16.vlgmr.msra.gmra.mxu0 %v305_v45 }
 0x29c   :  { %v411_v47 = vpop.f32.mrf.mxu0 }
 0x29d   :  { %v412_v48 = vadd.f32 %v445_v46, %v411_v47 }
 0x29e   :  { %v539_v49 = vpop.f32.mrf.mxu0 }
 0x29f   :  { %418 = vst [vmem:[%s748_s7] sm:$0xff] %v412_v48 }
 0x2a0   :  { %v414_v50 = vpop.f32.mrf.mxu0 }
 0x2a1   :  { %v415_v51 = vadd.f32 %v445_v46, %v414_v50 }
 0x2a2   :  { %v540_v52 = vpop.f32.mrf.mxu0 }
 0x2a3   :  { %419 = vst [vmem:[%s748_s7 + $0x8] sm:$0xff] %v415_v51 }
 0x2a4   :  { %424 = vsyncpa [#allocation3], 1 }
 0x2a5   :  { %425 = vsyncpa [#allocation5], 1 }

</bundles_post_ra>
